<compile_context>
chip_gen: v6e
topology: v6e:2x2x1
jax: 0.10.0
libtpu: 0.0.40
codegen_flags: <defaults>
</compile_context>

<pallas_src>
import jax
import jax.numpy as jnp
from jax.experimental import pallas as pl
from jax.experimental.pallas import tpu as pltpu

NEG_SLOPE = 0.01  # torch.nn.LeakyReLU default negative_slope


def _round_up(x: int, m: int) -> int:
    return (x + m - 1) // m * m


def _cdiv(a: int, b: int) -> int:
    return (a + b - 1) // b


def _vmem_budget_bytes() -> int:
    """Generation-aware scoped-VMEM budget (~75% of per-core physical VMEM)."""
    try:
        cap = int(getattr(pltpu.get_tpu_info(), "vmem_capacity_bytes", 64 * 2**20))
    except Exception:  # not on TPU / interpret mode -> conservative (v7x) default
        cap = 64 * 2**20
    return (3 * cap) // 4


def _conv_lrelu_kernel(col_ref, w_ref, out_ref):
    # col_ref: (TN, KC_pad)         bf16, pipelined per grid step
    # w_ref  : (KC_pad, C_out_pad)  bf16, resident (constant index_map)
    # out_ref: (TN, C_out_pad)      bf16, lane-dense -> unmasked full-lane vst
    acc = jnp.dot(col_ref[...], w_ref[...],
                  preferred_element_type=jnp.float32)        # one fused MXU GEMM
    out_ref[...] = jnp.maximum(acc, NEG_SLOPE * acc).astype(out_ref.dtype)


def octree_conv_leaky_relu(data, neigh, weights, *, tile_n=512,
                           compute_dtype=jnp.bfloat16):
    """data: (N, C_in) float; neigh: (N, K) int32 (-1 = empty neighbor);
    weights: (K, C_in, C_out) (ocnn convention). Returns (N, C_out) in data.dtype."""
    n_nodes, c_in = data.shape
    kdim = neigh.shape[1]
    c_out = weights.shape[2]
    kc = kdim * c_in

    cbytes = jnp.dtype(compute_dtype).itemsize
    out_dtype = compute_dtype  # bf16 output: halves the padded output write bytes
    obytes = jnp.dtype(out_dtype).itemsize

    # ---- lane padding of the GEMM dims -------------------------------------
    # c_out padded to 128 -> unmasked lane-dense stores.  (For real c_out in
    # (128, 256] this automatically lands on 256, matching the v6e/v7x MXU.)
    c_out_pad = _round_up(c_out, 128)
    # Contraction dim: fold the lane padding into extra zero "taps" when C_in
    # divides the pad, so the gather emits the final layout with no pad pass.
    kc_pad = _round_up(kc, 128)
    if (kc_pad - kc) % c_in == 0:
        k_pad = kdim + (kc_pad - kc) // c_in
    else:
        k_pad, kc_pad = kdim, kc  # full-dim block is still legal; skip lane pad

    # ---- tile_n: as big as the VMEM budget allows, but keep the grid >= 2 ---
    vmem_budget = _vmem_budget_bytes()

    def step_bytes(tn):
        # Double-buffered col + out tiles; the resident weight block is still
        # allocated twice by the pipeliner (constant index_map), so count 2x.
        return (2 * tn * kc_pad * cbytes
                + 2 * tn * c_out_pad * obytes
                + 2 * kc_pad * c_out_pad * cbytes)

    tile_n = max(8, _round_up(int(tile_n), 8))
    while tile_n > 128 and step_bytes(tile_n) > (55 * vmem_budget) // 100:
        tile_n //= 2
    while tile_n > 256 and _cdiv(n_nodes, tile_n) < 2:  # keep both v7x TCs busy
        tile_n //= 2
    n_pad = _round_up(n_nodes, tile_n)

    # ---- octree2col: one bf16 gather straight into the final layout ---------
    # Sentinel zero row at index n_nodes replaces the mask/where select; the
    # same sentinel fills the padded rows and the padded taps, so no separate
    # pad / cast / select pass ever touches the K*C_in-inflated col matrix.
    data_ext = jnp.concatenate(
        [data.astype(compute_dtype), jnp.zeros((1, c_in), compute_dtype)], axis=0)
    idx = jnp.where(neigh >= 0, neigh, n_nodes).astype(jnp.int32)
    idx = jnp.pad(idx, ((0, n_pad - n_nodes), (0, k_pad - kdim)),
                  constant_values=n_nodes)
    col = data_ext[idx].reshape(n_pad, kc_pad)            # (n_pad, kc_pad) bf16
    # TODO(synk): once C_in >= 128, move octree2col in-kernel (scalar-prefetched
    # neigh slice in SMEM + per-tap row DMAs / data resident in VMEM) to avoid
    # writing and re-reading the K*C_in col matrix in HBM entirely.

    w = weights.astype(compute_dtype)
    if k_pad > kdim:
        w = jnp.concatenate(
            [w, jnp.zeros((k_pad - kdim, c_in, c_out), compute_dtype)], axis=0)
    w = w.reshape(kc_pad, c_out)
    w = jnp.pad(w, ((0, 0), (0, c_out_pad - c_out)))       # tiny pad, bf16

    grid = (n_pad // tile_n,)
    vmem_limit = int(min(vmem_budget, max(32 * 2**20, 2 * step_bytes(tile_n))))

    out_padded = pl.pallas_call(
        _conv_lrelu_kernel,
        out_shape=jax.ShapeDtypeStruct((n_pad, c_out_pad), out_dtype),
        grid_spec=pltpu.PrefetchScalarGridSpec(
            num_scalar_prefetch=0,
            grid=grid,
            in_specs=[
                pl.BlockSpec((tile_n, kc_pad), lambda i: (i, 0)),     # col tile
                # Resident weights (constant index map).
                # TODO(synk): single-buffer via pipeline_mode=pl.Buffered(1) for
                # deep-channel layers to buy back VMEM under v7x's 64 MiB cap.
                pl.BlockSpec((kc_pad, c_out_pad), lambda i: (0, 0)),
            ],
            out_specs=pl.BlockSpec((tile_n, c_out_pad), lambda i: (i, 0)),
        ),
        compiler_params=pltpu.CompilerParams(
            dimension_semantics=("parallel",),
            vmem_limit_bytes=vmem_limit,
        ),
    )(col, w)

    return out_padded[:n_nodes, :c_out].astype(data.dtype)


def reference(data, neigh, weights, compute_dtype=jnp.bfloat16):
    """Pure-JAX reference (bf16 operands, f32 accumulation, f32 output)."""
    n_nodes, c_in = data.shape
    kdim = neigh.shape[1]
    c_out = weights.shape[2]
    mask = neigh >= 0
    safe = jnp.where(mask, neigh, 0)
    col = jnp.where(mask[..., None], data[safe], 0.0)
    col = col.astype(compute_dtype).astype(jnp.float32).reshape(n_nodes, kdim * c_in)
    w = weights.reshape(kdim * c_in, c_out).astype(compute_dtype).astype(jnp.float32)
    out = col @ w
    return jnp.maximum(out, NEG_SLOPE * out)


if __name__ == "__main__":
    # Small synthetic octree: 1000 nodes (deliberately NOT a tile multiple),
    # C_in=8, C_out=16, kernel_size=[3] -> kdim = 27 neighbor taps per node.
    N_NODES, C_IN, C_OUT, KDIM = 1000, 8, 16, 27

    key = jax.random.PRNGKey(0)
    k_data, k_neigh, k_w = jax.random.split(key, 3)

    data = jax.random.normal(k_data, (N_NODES, C_IN), dtype=jnp.float32)
    # Neighbor table: entries in [-1, N_NODES); -1 marks empty neighbors.
    neigh = jax.random.randint(k_neigh, (N_NODES, KDIM), -1, N_NODES, dtype=jnp.int32)
    # ocnn weight shape: (kdim, in_channels, out_channels).
    weights = (jax.random.normal(k_w, (KDIM, C_IN, C_OUT), dtype=jnp.float32)
               * (1.0 / jnp.sqrt(KDIM * C_IN)))

    out = octree_conv_leaky_relu(data, neigh, weights)
    out = jax.block_until_ready(out).astype(jnp.float32)

    ref = reference(data, neigh, weights)
    assert out.shape == (N_NODES, C_OUT)
    # Tolerance covers bf16 output storage (half-ulp ~ 2^-9 relative) plus
    # f32-accumulation ordering differences between MXU and XLA matmul.
    max_err = float(jnp.max(jnp.abs(out - ref)))
    assert jnp.allclose(out, ref, atol=2e-3, rtol=5e-3), f"mismatch vs reference: {max_err}"

    print("KERNEL_OK")
</pallas_src>

<mosaic_0001>
module attributes {stable_mosaic.version = 11 : i64} {
  func.func @_conv_lrelu_kernel(%arg0: i32, %arg1: memref<512x256xbf16, #tpu.memory_space<vmem>>, %arg2: memref<256x128xbf16, #tpu.memory_space<vmem>>, %arg3: memref<512x128xbf16, #tpu.memory_space<vmem>>) attributes {dimension_semantics = [#tpu.dimension_semantics<parallel>], iteration_bounds = array<i64: 2>, scalar_prefetch = 0 : i64, scratch_operands = 0 : i64, tpu.core_type = #tpu.core_type<tc>, window_params = [{transform_indices = @transform_0, window_bounds = array<i64: 512, 256>}, {pipeline_mode = #tpu.pipeline_mode<synchronous>, transform_indices = @transform_1, window_bounds = array<i64: 256, 128>}, {transform_indices = @transform_2, window_bounds = array<i64: 512, 128>}]} {
    %c0 = arith.constant 0 : index
    %c0_0 = arith.constant 0 : index
    %0 = vector.load %arg1[%c0, %c0_0] : memref<512x256xbf16, #tpu.memory_space<vmem>>, vector<512x256xbf16>
    %c0_1 = arith.constant 0 : index
    %c0_2 = arith.constant 0 : index
    %1 = vector.load %arg2[%c0_1, %c0_2] : memref<256x128xbf16, #tpu.memory_space<vmem>>, vector<256x128xbf16>
    %cst = arith.constant dense<0.000000e+00> : vector<512x128xf32>
    %2 = tpu.matmul %0, %1, %cst {dimension_numbers = #tpu.dot_dimension_numbers<[1], [0], [0], [1], [0, 0, 1, 1], [], []>} : vector<512x256xbf16>, vector<256x128xbf16>, vector<512x128xf32> -> vector<512x128xf32>
    %cst_3 = arith.constant 0.00999999977 : f32
    %3 = vector.broadcast %cst_3 : f32 to vector<512x128xf32>
    %4 = arith.mulf %3, %2 : vector<512x128xf32>
    %5 = arith.maximumf %2, %4 : vector<512x128xf32>
    %6 = arith.truncf %5 : vector<512x128xf32> to vector<512x128xbf16>
    %c0_4 = arith.constant 0 : index
    %c0_5 = arith.constant 0 : index
    %7 = vector.load %arg3[%c0_4, %c0_5] : memref<512x128xbf16, #tpu.memory_space<vmem>>, vector<512x128xbf16>
    tpu.vector_store %arg3[%c0_4, %c0_5], %6 {strides = array<i32>} : memref<512x128xbf16, #tpu.memory_space<vmem>>, vector<512x128xbf16>,
    return
  }
  func.func @transform_0(%arg0: i32) -> (i32, i32) {
    %c0_i32 = arith.constant 0 : i32
    %c0_i32_0 = arith.constant 0 : i32
    return %arg0, %c0_i32 : i32, i32
  }
  func.func @transform_1(%arg0: i32) -> (i32, i32) {
    %c0_i32 = arith.constant 0 : i32
    %c0_i32_0 = arith.constant 0 : i32
    %c0_i32_1 = arith.constant 0 : i32
    return %c0_i32, %c0_i32_0 : i32, i32
  }
  func.func @transform_2(%arg0: i32) -> (i32, i32) {
    %c0_i32 = arith.constant 0 : i32
    %c0_i32_0 = arith.constant 0 : i32
    return %arg0, %c0_i32 : i32, i32
  }
}

</mosaic_0001>

<bundles_post_ra>
// kernel: tpu_custom_call.1
= control target key start
LH: loop header
LB: loop body
LE: loop exit
PB: predicated region body
PF: predicated region fallthrough
CT: control target
= control target key end

     0   :  { %7 = vsyncpa [#allocation3], 0  ;;  %s2614_s0 = inlined_call_operand.hbm [shape: bf16[1024,256], index: 0, kind: input, shape index: {}]   ;;  %s2615_s1 = inlined_call_operand.hbm [shape: bf16[256,128], index: 1, kind: input, shape index: {}]   ;;  %s2616_s2 = inlined_call_operand.hbm [shape: bf16[1024,128], index: 2, kind: output, shape index: {}]  }
   0x1   :  { %9 = vsyncpa [#allocation3 + $0x1], 0 }
   0x2   :  { %10 = vsyncpa [#allocation6], 0 }
   0x3   :  { %11 = vsyncpa [#allocation4], 0 }
   0x4   :  { %13 = vsyncpa [#allocation4 + $0x1], 0  ;;  %s2303_s9 = smov 0   ;;  %s2305_s10 = smov 0  }
   0x5   :  { %s2307_s11 = smov 0   ;;  %s2309_s12 = smov 0  }
   0x6 LB: > { %s2324_s13 = sadd.s32 4294967295, %s2276_s12   ;;  %s1527_s14 = sadd.s32 4294967294, %s2276_s12   ;;  %s2276_s12 = sphi %s2309_s12, %s2638_s12   ;;  %s2272_s11 = sphi %s2307_s11, %s2637_s11   ;;  %s2268_s10 = sphi %s2305_s10, %s2636_s10   ;;  %s2264_s9 = sphi %s2303_s9, %s2635_s9  }
   0x7   : > { %p39_p0 = scmp.ne.s32.totalorder %s2268_s10, %s2264_s9  ;;  %p2617_p1 = scmp.eq.s32.totalorder %s2324_s13, 0 }
   0x8   : > { %p90_p3 = scmp.eq.s32.totalorder %s1527_s14, 1  ;;  %p1528_p5 = scmp.ge.s32.totalorder %s2276_s12, 1 }
   0x9   : > { %p2333_p4 = por %p2617_p1, %p39_p0  ;;  %p97_p7 = scmp.lt.s32.totalorder %s2276_s12, 3 }
   0xa   : > { %p2338_p6 = por %p90_p3, %p39_p0  ;;  %s2278_s18 = smov [#allocation5]  }
   0xb   : > { %s2621_s15 = scalar_select %p2333_p4, 1, 0 }
   0xc   : > { %s2622_s16 = scalar_select %p2338_p6, 1, 0 }
   0xd   : > { %p2343_p8 = pnand %p1528_p5, %p97_p7  ;;  %s109_s19 = sshll.u32 %s2278_s18, 4  ;;  %s110_s19 = int_to_ptr.vmem [resolvable:$true] %s109_s19 }
   0xe   : > { %s2357_s21 = sadd.s32 1, %s2276_s12   ;;  %s26_s22 = sadd.s32 1, %s2272_s11 }
   0xf   : > { %s2623_s17 = scalar_select %p2343_p8, 1, 0 }
  0x10   : > { %p1986_p9 = pneg %p2343_p8  ;;  %s23_s23 = ssub.s32 %s2276_s12, %s2357_s21 }
  0x11   : > { %s2165_s24 = scalar_lea.vmem %s110_s19, 2048  ;;  %p2173_p5 = scmp.lt.s32.totalorder %s110_s19, %s110_s19 }
  0x12   : > { %p2352_p11 = pnand %p1986_p9, %p2617_p1  ;;  %p2166_p13 = scmp.ne.s32.totalorder %s110_s19, %s2165_s24 }
  0x13   : > { %p2174_p7 = scmp.lt.s32.totalorder %s2165_s24, %s2165_s24 }
  0x14   : > { %p2156_p12 = pneg %p2352_p11 }
  0x15   : > { %p2175_p10 = por %p2174_p7, %p2173_p5 }
  0x16   : > { %p2168_p0 = pnand %p2166_p13, %p2156_p12 }
  0x18   : > { %p2169_p3 = pneg %p2168_p0 }
  0x1a   : > { %p2176_p2 = pnand %p2175_p10, %p2169_p3 }
  0x1c   : > { %2179 = shalt.err (!%p2176_p2)
}
  0x1d   : > { %s2279_s25 = smov 64   ;;  %s2280_s26 = smov 4  }
  0x1e   : > { %1989 = dma.hbm_to_vmem [thread:$0]  (!%p2352_p11), %s2615_s1, 2048, %s110_s19, [#allocation6], %s2279_s25, %s2279_s25, %s2280_s26  }
  0x1f   : > { %p24_p9 = scmp.eq.s32.totalorder %s23_s23, 0  ;;  %p33_p12 = scmp.ne.s32.totalorder %s2272_s11, %s2268_s10 }
  0x20   : > { %p34_p10 = scmp.eq.s32.totalorder %s2276_s12, 0  ;;  %p1999_p2 = scmp.lt.s32.totalorder %s2276_s12, 2 }
  0x21   : > { %s2374_s29 = scalar_select %p24_p9, %s2272_s11, %s26_s22  }
  0x22   : > { %p35_p13 = por %p34_p10, %p33_p12  ;;  %p2625_p0 = scmp.eq.s32.totalorder %s2324_s13, 1 }
  0x23   : > { %s123_s3 = sand.u32 1, %s2272_s11   ;;  %s1689_s4 = sshll.u32 %s2276_s12, 13 }
  0x24   : > { %p2378_p3 = por %p2625_p0, %p33_p12  ;;  %s1531_s5 = sshll.u32 %s123_s3, 9 }
  0x25   : > { %s2387_s8 = scalar_lea.hbm %s2614_s0, %s1689_s4  ;;  %s127_s14 = scalar_lea.vmem [#allocation2], %s1531_s5 }
  0x26   : > { %s2626_s30 = scalar_select %p2378_p3, 1, 0 }
  0x27   : > { %s135_s18 = sshll.u32 %s127_s14, 4  ;;  %p2389_p11 = pnand %p1999_p2, %p35_p13  ;;  %s2393_s18 = int_to_ptr.vmem [resolvable:$true] %s135_s18 }
  0x28   : > { %s2395_s20 = scalar_lea.sflag [#allocation3], %s123_s3  ;;  %s2180_s22 = scalar_lea.hbm %s2387_s8, 8192 }
  0x29   : > { %p2181_p5 = scmp.ne.s32.totalorder %s2387_s8, %s2180_s22  ;;  %p2182_p7 = pneg %p2389_p11 }
  0x2a   : > { %s2185_s25 = scalar_lea.hbm %s2614_s0, 16384  ;;  %p2186_p10 = scmp.lt.s32.totalorder %s2387_s8, %s2614_s0 }
  0x2b   : > { %p2183_p9 = pnand %p2182_p7, %p2181_p5  ;;  %p2187_p2 = scmp.lt.s32.totalorder %s2185_s25, %s2180_s22 }
  0x2d   : > { %p2184_p12 = pneg %p2183_p9  ;;  %p2188_p13 = por %p2187_p2, %p2186_p10 }
  0x2f   : > { %p2189_p0 = pnand %p2188_p13, %p2184_p12 }
  0x31   : > { %2192 = shalt.err (!%p2189_p0)
}
  0x32   : > { %s2193_s28 = scalar_lea.vmem %s2393_s18, 8192  ;;  %s2281_s3 = smov [#allocation2]  }
  0x33   : > { %p2194_p1 = scmp.ne.s32.totalorder %s2393_s18, %s2193_s28  ;;  %s2198_s4 = sshll.u32 %s2281_s3, 4  ;;  %s2199_s4 = int_to_ptr.vmem [resolvable:$false] %s2198_s4 }
  0x34   : > { %s2200_s5 = scalar_lea.vmem %s2199_s4, 16384  ;;  %p2201_p9 = scmp.lt.s32.totalorder %s2393_s18, %s2199_s4 }
  0x35   : > { %p2196_p6 = pnand %p2194_p1, %p2182_p7  ;;  %p2202_p3 = scmp.lt.s32.totalorder %s2200_s5, %s2193_s28 }
  0x37   : > { %p2197_p5 = pneg %p2196_p6  ;;  %p2203_p4 = por %p2202_p3, %p2201_p9 }
  0x39   : > { %p2204_p8 = pnand %p2203_p4, %p2197_p5 }
  0x3b   : > { %2207 = shalt.err (!%p2204_p8)
}
  0x3c   : > { %s2282_s6 = smov 128   ;;  %s2283_s7 = smov 8  }
  0x3d   : > { %1993 = dma.hbm_to_vmem [thread:$0]  (!%p2389_p11), %s2387_s8, 8192, %s2393_s18, %s2395_s20, %s2282_s6, %s2282_s6, %s2283_s7  }
  0x3e   : > { %p2628_p1 = scmp.ne.s32.totalorder %s2623_s17, 0 }
  0x3f   : > { %s2419_s14 = sand.u32 (!%p2628_p1), 1, %s2268_s10   ;;  %p2629_p4 = scmp.ne.s32.totalorder (!%p2628_p1), %s2621_s15, 0 }
  0x40   : > { %147 = sbr.rel (%p2628_p1) target bundleno = 475 (0x1db), region = 28  ;;  %s1536_s22 = sshll.u32 (!%p2628_p1), %s2419_s14, 9 }
  0x41   : > { %s150_s23 = scalar_lea.sflag (!%p2628_p1), [#allocation3], %s2419_s14  ;;  %s2423_s24 = scalar_lea.vmem (!%p2628_p1), [#allocation2], %s1536_s22 }
  0x45   : > { %2251 = dma.done.wait (%p2629_p4), %s150_s23, 8192  }
  0x46   : > { %2253 = vsyncadd (%p2629_p4), %s150_s23, 4294959104  ;;  %p2630_p6 = scmp.eq.s32.totalorder %s2324_s13, 0 }
  0x48   : > { %2255 = dma.done.wait (%p2630_p6), [#allocation6], 2048   ;;  %p2631_p8 = pmov %p2630_p6 }
  0x49   : > { %v2284_v0 = vmov 0   ;;  %v2042_v1 = vld [vmem:[#allocation5 + $0x38] sm:$0xff]   ;;  %v2043_v2 = vld [vmem:[#allocation5 + $0x30] sm:$0xff]   ;;  %v2044_v3 = vld [vmem:[#allocation5 + $0x28] sm:$0xff]   ;;  %s1538_s15 = sshll.u32 %s2419_s14, 8  ;;  %s1754_s8 = sshll.u32 %s2324_s13, 12 }
  0x4a   : > { %2257 = vsyncadd (%p2631_p8), [#allocation6], 4294965248  ;;  %693 = vmatprep.subr.bf16.mxu0 %v2284_v0  ;;  %1946 = vmatprep.subr.bf16.mxu1 %v2284_v0  ;;  %v2045_v4 = vld [vmem:[#allocation5 + $0x20] sm:$0xff]   ;;  %v2046_v5 = vld [vmem:[#allocation5 + $0x18] sm:$0xff]   ;;  %s2530_s17 = scalar_lea.vmem [#allocation7], %s1538_s15  ;;  %s2567_s25 = scalar_lea.hbm %s2616_s2, %s1754_s8 }
  0x4b   : > { %694 = vmatpush1.bf16.msra.mxu0 %v2042_v1  ;;  %1962 = vmatpush1.bf16.msra.mxu1 %v2042_v1  ;;  %v2060_v6 = vld [vmem:[%s2423_s24 + $0x4] ss:$8 sps:$4 sm:$0xff]   ;;  %v2047_v7 = vld [vmem:[#allocation5 + $0x10] sm:$0xff]   ;;  %v2050_v11 = vld [vmem:[#allocation5 + $0x78] sm:$0xff]   ;;  %s1444_s18 = sshll.u32 %s2530_s17, 4  ;;  %s1431_s13 = scalar_lea.sflag [#allocation4], %s2419_s14  ;;  %s2569_s18 = int_to_ptr.vmem [resolvable:$true] %s1444_s18 }
  0x4c   : > { %695 = vmatprep.subr.bf16.mxu0 %v2284_v0  ;;  %1947 = vmatprep.subr.bf16.mxu1 %v2284_v0  ;;  %v2063_v8 = vld [vmem:[%s2423_s24 + $0x104] ss:$8 sps:$4 sm:$0xff]   ;;  %v2051_v12 = vld [vmem:[#allocation5 + $0x70] sm:$0xff]   ;;  %v2054_v15 = vld [vmem:[#allocation5 + $0x58] sm:$0xff]   ;;  %s2208_s26 = scalar_lea.vmem %s2569_s18, 4096  ;;  %p2632_p11 = scmp.ne.s32.totalorder %s2626_s30, 0 }
  0x4d   : > { %725 = vmatprep.mubr.bf16.mxu0 %v2060_v6  ;;  %853 = vmatprep.mubr.bf16.mxu1 %v2063_v8  ;;  %v2048_v9 = vld [vmem:[#allocation5 + $0x8] sm:$0xff]   ;;  %v2049_v10 = vld [vmem:[#allocation5] sm:$0xff]   ;;  %v2055_v16 = vld [vmem:[#allocation5 + $0x50] sm:$0xff]   ;;  %p2209_p3 = scmp.ne.s32.totalorder %s2569_s18, %s2208_s26  ;;  %s2285_s27 = smov [#allocation7]  }
  0x4e   : > { %v2052_v13 = vld [vmem:[#allocation5 + $0x68] sm:$0xff]   ;;  %v2053_v14 = vld [vmem:[#allocation5 + $0x60] sm:$0xff]   ;;  %v2064_v21 = vld [vmem:[%s2423_s24 + $0x14] ss:$8 sps:$4 sm:$0xff]   ;;  %s2212_s28 = sshll.u32 %s2285_s27, 4  ;;  %s2213_s28 = int_to_ptr.vmem [resolvable:$false] %s2212_s28 }
  0x4f   : > { %696 = vmatpush1.bf16.msra.mxu0 %v2043_v2  ;;  %1963 = vmatpush1.bf16.msra.mxu1 %v2043_v2  ;;  %v2056_v17 = vld [vmem:[#allocation5 + $0x48] sm:$0xff]   ;;  %v2057_v18 = vld [vmem:[#allocation5 + $0x40] sm:$0xff]   ;;  %v2066_v22 = vld [vmem:[%s2423_s24 + $0x114] ss:$8 sps:$4 sm:$0xff]   ;;  %p2210_p7 = pnand %p2209_p3, %p2632_p11  ;;  %s2214_s3 = scalar_lea.vmem %s2213_s28, 8192 }
  0x50   : > { %697 = vmatprep.subr.bf16.mxu0 %v2284_v0  ;;  %1948 = vmatprep.subr.bf16.mxu1 %v2284_v0  ;;  %v2058_v19 = vld [vmem:[%s2423_s24] ss:$8 sps:$4 sm:$0xff]   ;;  %v2068_v23 = vld [vmem:[%s2423_s24 + $0x10] ss:$8 sps:$4 sm:$0xff]   ;;  %v2070_v25 = vld [vmem:[%s2423_s24 + $0x24] ss:$8 sps:$4 sm:$0xff]   ;;  %p2215_p10 = scmp.lt.s32.totalorder %s2569_s18, %s2213_s28  ;;  %p2216_p2 = scmp.lt.s32.totalorder %s2214_s3, %s2208_s26 }
  0x51   : > { %v2061_v20 = vld [vmem:[%s2423_s24 + $0x100] ss:$8 sps:$4 sm:$0xff]   ;;  %v2069_v24 = vld [vmem:[%s2423_s24 + $0x110] ss:$8 sps:$4 sm:$0xff]   ;;  %v2072_v26 = vld [vmem:[%s2423_s24 + $0x124] ss:$8 sps:$4 sm:$0xff]   ;;  %p2211_p12 = pneg %p2210_p7 }
  0x52   : > { %v2074_v27 = vld [vmem:[%s2423_s24 + $0x20] ss:$8 sps:$4 sm:$0xff]   ;;  %v2076_v29 = vld [vmem:[%s2423_s24 + $0x34] ss:$8 sps:$4 sm:$0xff]   ;;  %v2080_v31 = vld [vmem:[%s2423_s24 + $0x30] ss:$8 sps:$4 sm:$0xff]   ;;  %p2217_p13 = por %p2216_p2, %p2215_p10 }
  0x53   : > { %698 = vmatpush1.bf16.msra.mxu0 %v2044_v3  ;;  %1964 = vmatpush1.bf16.msra.mxu1 %v2044_v3  ;;  %v2075_v28 = vld [vmem:[%s2423_s24 + $0x120] ss:$8 sps:$4 sm:$0xff]   ;;  %v2078_v30 = vld [vmem:[%s2423_s24 + $0x134] ss:$8 sps:$4 sm:$0xff]   ;;  %v2081_v32 = vld [vmem:[%s2423_s24 + $0x130] ss:$8 sps:$4 sm:$0xff]  }
  0x54   : > { %699 = vmatprep.subr.bf16.mxu0 %v2284_v0  ;;  %1949 = vmatprep.subr.bf16.mxu1 %v2284_v0  ;;  %v2082_v33 = vld [vmem:[%s2423_s24 + $0x44] ss:$8 sps:$4 sm:$0xff]   ;;  %v2086_v35 = vld [vmem:[%s2423_s24 + $0x40] ss:$8 sps:$4 sm:$0xff]   ;;  %v2088_v37 = vld [vmem:[%s2423_s24 + $0x54] ss:$8 sps:$4 sm:$0xff]   ;;  %p2218_p0 = pnand %p2217_p13, %p2211_p12 }
  0x55   : > { %v2084_v34 = vld [vmem:[%s2423_s24 + $0x144] ss:$8 sps:$4 sm:$0xff]   ;;  %v2087_v36 = vld [vmem:[%s2423_s24 + $0x140] ss:$8 sps:$4 sm:$0xff]   ;;  %v2090_v38 = vld [vmem:[%s2423_s24 + $0x154] ss:$8 sps:$4 sm:$0xff]  }
  0x56   : > { %v2092_v39 = vld [vmem:[%s2423_s24 + $0x50] ss:$8 sps:$4 sm:$0xff]   ;;  %v2094_v41 = vld [vmem:[%s2423_s24 + $0x64] ss:$8 sps:$4 sm:$0xff]   ;;  %v2098_v43 = vld [vmem:[%s2423_s24 + $0x60] ss:$8 sps:$4 sm:$0xff]  }
  0x57   : > { %700 = vmatpush1.bf16.msra.mxu0 %v2045_v4  ;;  %1965 = vmatpush1.bf16.msra.mxu1 %v2045_v4  ;;  %v2093_v40 = vld [vmem:[%s2423_s24 + $0x150] ss:$8 sps:$4 sm:$0xff]   ;;  %v2096_v42 = vld [vmem:[%s2423_s24 + $0x164] ss:$8 sps:$4 sm:$0xff]   ;;  %v2099_v44 = vld [vmem:[%s2423_s24 + $0x160] ss:$8 sps:$4 sm:$0xff]  }
  0x58   : > { %701 = vmatprep.subr.bf16.mxu0 %v2284_v0  ;;  %1950 = vmatprep.subr.bf16.mxu1 %v2284_v0  ;;  %v2100_v45 = vld [vmem:[%s2423_s24 + $0x74] ss:$8 sps:$4 sm:$0xff]   ;;  %v2104_v47 = vld [vmem:[%s2423_s24 + $0x70] ss:$8 sps:$4 sm:$0xff]   ;;  %v2106_v49 = vld [vmem:[%s2423_s24 + $0x84] ss:$8 sps:$4 sm:$0xff]  }
  0x59   : > { %v2102_v46 = vld [vmem:[%s2423_s24 + $0x174] ss:$8 sps:$4 sm:$0xff]   ;;  %v2105_v48 = vld [vmem:[%s2423_s24 + $0x170] ss:$8 sps:$4 sm:$0xff]   ;;  %v2108_v50 = vld [vmem:[%s2423_s24 + $0x184] ss:$8 sps:$4 sm:$0xff]  }
  0x5a   : > { %v2110_v51 = vld [vmem:[%s2423_s24 + $0x80] ss:$8 sps:$4 sm:$0xff]   ;;  %v2112_v53 = vld [vmem:[%s2423_s24 + $0x94] ss:$8 sps:$4 sm:$0xff]   ;;  %v2116_v55 = vld [vmem:[%s2423_s24 + $0x90] ss:$8 sps:$4 sm:$0xff]  }
  0x5b   : > { %702 = vmatpush1.bf16.msra.mxu0 %v2046_v5  ;;  %1966 = vmatpush1.bf16.msra.mxu1 %v2046_v5  ;;  %v2111_v52 = vld [vmem:[%s2423_s24 + $0x180] ss:$8 sps:$4 sm:$0xff]   ;;  %v2114_v54 = vld [vmem:[%s2423_s24 + $0x194] ss:$8 sps:$4 sm:$0xff]   ;;  %v2117_v56 = vld [vmem:[%s2423_s24 + $0x190] ss:$8 sps:$4 sm:$0xff]  }
  0x5c   : > { %703 = vmatprep.subr.bf16.mxu0 %v2284_v0  ;;  %1951 = vmatprep.subr.bf16.mxu1 %v2284_v0  ;;  %v2118_v57 = vld [vmem:[%s2423_s24 + $0xa4] ss:$8 sps:$4 sm:$0xff]   ;;  %v2122_v59 = vld [vmem:[%s2423_s24 + $0xa0] ss:$8 sps:$4 sm:$0xff]   ;;  %v2124_v61 = vld [vmem:[%s2423_s24 + $0xb4] ss:$8 sps:$4 sm:$0xff]  }
  0x5d   : > { %v2120_v58 = vld [vmem:[%s2423_s24 + $0x1a4] ss:$8 sps:$4 sm:$0xff]   ;;  %v2123_v60 = vld [vmem:[%s2423_s24 + $0x1a0] ss:$8 sps:$4 sm:$0xff]   ;;  %v2126_v62 = vld [vmem:[%s2423_s24 + $0x1b4] ss:$8 sps:$4 sm:$0xff]  }
  0x5e   : > { %v2128_v63 = vld [vmem:[%s2423_s24 + $0xb0] ss:$8 sps:$4 sm:$0xff]   ;;  %v2130_v1 = vld [vmem:[%s2423_s24 + $0xc4] ss:$8 sps:$4 sm:$0xff]   ;;  %v2134_v3 = vld [vmem:[%s2423_s24 + $0xc0] ss:$8 sps:$4 sm:$0xff]  }
  0x5f   : > { %704 = vmatpush1.bf16.msra.mxu0 %v2047_v7  ;;  %1967 = vmatpush1.bf16.msra.mxu1 %v2047_v7  ;;  %v2132_v2 = vld [vmem:[%s2423_s24 + $0x1c4] ss:$8 sps:$4 sm:$0xff]   ;;  %v2135_v4 = vld [vmem:[%s2423_s24 + $0x1c0] ss:$8 sps:$4 sm:$0xff]   ;;  %v2136_v5 = vld [vmem:[%s2423_s24 + $0xd4] ss:$8 sps:$4 sm:$0xff]  }
  0x60   : > { %705 = vmatprep.subr.bf16.mxu0 %v2284_v0  ;;  %1952 = vmatprep.subr.bf16.mxu1 %v2284_v0  ;;  %v2138_v6 = vld [vmem:[%s2423_s24 + $0x1d4] ss:$8 sps:$4 sm:$0xff]   ;;  %v2140_v7 = vld [vmem:[%s2423_s24 + $0xd0] ss:$8 sps:$4 sm:$0xff]  }
  0x61   : > { %v2141_v8 = vld [vmem:[%s2423_s24 + $0x1d0] ss:$8 sps:$4 sm:$0xff]  }
  0x63   : > { %706 = vmatpush1.bf16.msra.mxu0 %v2048_v9  ;;  %1968 = vmatpush1.bf16.msra.mxu1 %v2048_v9  ;;  %v2142_v9 = vld [vmem:[%s2423_s24 + $0xe4] ss:$8 sps:$4 sm:$0xff]  }
  0x64   : > { %707 = vmatprep.subr.bf16.mxu0 %v2284_v0  ;;  %1953 = vmatprep.subr.bf16.mxu1 %v2284_v0 }
  0x67   : > { %708 = vmatpush1.bf16.msra.mxu0 %v2049_v10  ;;  %1969 = vmatpush1.bf16.msra.mxu1 %v2049_v10  ;;  %v2144_v10 = vld [vmem:[%s2423_s24 + $0x1e4] ss:$8 sps:$4 sm:$0xff]  }
  0x68   : > { %709 = vmatprep.subr.bf16.mxu0 %v2284_v0  ;;  %1954 = vmatprep.subr.bf16.mxu1 %v2284_v0 }
  0x6b   : > { %710 = vmatpush2.bf16.msra.mxu0 %v2050_v11  ;;  %1970 = vmatpush2.bf16.msra.mxu1 %v2050_v11  ;;  %v2146_v11 = vld [vmem:[%s2423_s24 + $0xe0] ss:$8 sps:$4 sm:$0xff]  }
  0x6c   : > { %711 = vmatprep.subr.bf16.mxu0 %v2284_v0  ;;  %1955 = vmatprep.subr.bf16.mxu1 %v2284_v0 }
  0x6f   : > { %712 = vmatpush2.bf16.msra.mxu0 %v2051_v12  ;;  %1971 = vmatpush2.bf16.msra.mxu1 %v2051_v12  ;;  %v2147_v12 = vld [vmem:[%s2423_s24 + $0x1e0] ss:$8 sps:$4 sm:$0xff]  }
  0x70   : > { %713 = vmatprep.subr.bf16.mxu0 %v2284_v0  ;;  %1956 = vmatprep.subr.bf16.mxu1 %v2284_v0 }
  0x73   : > { %714 = vmatpush2.bf16.msra.mxu0 %v2052_v13  ;;  %1972 = vmatpush2.bf16.msra.mxu1 %v2052_v13  ;;  %v2148_v13 = vld [vmem:[%s2423_s24 + $0xf4] ss:$8 sps:$4 sm:$0xff]  }
  0x74   : > { %715 = vmatprep.subr.bf16.mxu0 %v2284_v0  ;;  %1957 = vmatprep.subr.bf16.mxu1 %v2284_v0 }
  0x77   : > { %716 = vmatpush2.bf16.msra.mxu0 %v2053_v14  ;;  %1973 = vmatpush2.bf16.msra.mxu1 %v2053_v14  ;;  %v2150_v14 = vld [vmem:[%s2423_s24 + $0x1f4] ss:$8 sps:$4 sm:$0xff]  }
  0x78   : > { %717 = vmatprep.subr.bf16.mxu0 %v2284_v0  ;;  %1958 = vmatprep.subr.bf16.mxu1 %v2284_v0 }
  0x7b   : > { %718 = vmatpush2.bf16.msra.mxu0 %v2054_v15  ;;  %1974 = vmatpush2.bf16.msra.mxu1 %v2054_v15  ;;  %v2152_v15 = vld [vmem:[%s2423_s24 + $0xf0] ss:$8 sps:$4 sm:$0xff]  }
  0x7c   : > { %719 = vmatprep.subr.bf16.mxu0 %v2284_v0  ;;  %1959 = vmatprep.subr.bf16.mxu1 %v2284_v0 }
  0x7f   : > { %720 = vmatpush2.bf16.msra.mxu0 %v2055_v16  ;;  %1975 = vmatpush2.bf16.msra.mxu1 %v2055_v16  ;;  %v2153_v16 = vld [vmem:[%s2423_s24 + $0x1f0] ss:$8 sps:$4 sm:$0xff]  }
  0x80   : > { %721 = vmatprep.subr.bf16.mxu0 %v2284_v0  ;;  %1960 = vmatprep.subr.bf16.mxu1 %v2284_v0 }
  0x83   : > { %722 = vmatpush2.bf16.msra.mxu0 %v2056_v17  ;;  %1976 = vmatpush2.bf16.msra.mxu1 %v2056_v17 }
  0x84   : > { %723 = vmatprep.subr.bf16.mxu0 %v2284_v0  ;;  %1961 = vmatprep.subr.bf16.mxu1 %v2284_v0  ;;  %v2129_v0 = vld [vmem:[%s2423_s24 + $0x1b0] ss:$8 sps:$4 sm:$0xff]  }
  0x87   : > { %724 = vmatpush2.bf16.msra.mxu0 %v2057_v18  ;;  %1977 = vmatpush2.bf16.msra.mxu1 %v2057_v18 }
  0x8a   : > { %726 = vmatmul.mubr.bf16.vlgmr.msra.gmra.mxu0 %v2058_v19  ;;  %854 = vmatmul.mubr.bf16.vlgmr.msra.gmra.mxu1 %v2061_v20 }
  0x8b   : > { %733 = vmatprep.mubr.bf16.mxu0 %v2064_v21  ;;  %861 = vmatprep.mubr.bf16.mxu1 %v2066_v22 }
  0x92   : > { %734 = vmatmul.mubr.bf16.gmra.mxu0 %v2068_v23  ;;  %862 = vmatmul.mubr.bf16.gmra.mxu1 %v2069_v24 }
  0x93   : > { %741 = vmatprep.mubr.bf16.mxu0 %v2070_v25  ;;  %869 = vmatprep.mubr.bf16.mxu1 %v2072_v26 }
  0x9a   : > { %742 = vmatmul.mubr.bf16.gmra.mxu0 %v2074_v27  ;;  %870 = vmatmul.mubr.bf16.gmra.mxu1 %v2075_v28 }
  0x9b   : > { %749 = vmatprep.mubr.bf16.mxu0 %v2076_v29  ;;  %877 = vmatprep.mubr.bf16.mxu1 %v2078_v30 }
  0xa2   : > { %750 = vmatmul.mubr.bf16.gmra.mxu0 %v2080_v31  ;;  %878 = vmatmul.mubr.bf16.gmra.mxu1 %v2081_v32 }
  0xa3   : > { %757 = vmatprep.mubr.bf16.mxu0 %v2082_v33  ;;  %885 = vmatprep.mubr.bf16.mxu1 %v2084_v34 }
  0xaa   : > { %758 = vmatmul.mubr.bf16.gmra.mxu0 %v2086_v35  ;;  %886 = vmatmul.mubr.bf16.gmra.mxu1 %v2087_v36 }
  0xab   : > { %765 = vmatprep.mubr.bf16.mxu0 %v2088_v37  ;;  %893 = vmatprep.mubr.bf16.mxu1 %v2090_v38 }
  0xb2   : > { %766 = vmatmul.mubr.bf16.gmra.mxu0 %v2092_v39  ;;  %894 = vmatmul.mubr.bf16.gmra.mxu1 %v2093_v40 }
  0xb3   : > { %773 = vmatprep.mubr.bf16.mxu0 %v2094_v41  ;;  %901 = vmatprep.mubr.bf16.mxu1 %v2096_v42 }
  0xba   : > { %774 = vmatmul.mubr.bf16.gmra.mxu0 %v2098_v43  ;;  %902 = vmatmul.mubr.bf16.gmra.mxu1 %v2099_v44 }
  0xbb   : > { %781 = vmatprep.mubr.bf16.mxu0 %v2100_v45  ;;  %909 = vmatprep.mubr.bf16.mxu1 %v2102_v46 }
  0xc2   : > { %782 = vmatmul.mubr.bf16.gmra.mxu0 %v2104_v47  ;;  %910 = vmatmul.mubr.bf16.gmra.mxu1 %v2105_v48 }
  0xc3   : > { %789 = vmatprep.mubr.bf16.mxu0 %v2106_v49  ;;  %917 = vmatprep.mubr.bf16.mxu1 %v2108_v50 }
  0xca   : > { %790 = vmatmul.mubr.bf16.gmra.mxu0 %v2110_v51  ;;  %918 = vmatmul.mubr.bf16.gmra.mxu1 %v2111_v52 }
  0xcb   : > { %797 = vmatprep.mubr.bf16.mxu0 %v2112_v53  ;;  %925 = vmatprep.mubr.bf16.mxu1 %v2114_v54 }
  0xd2   : > { %798 = vmatmul.mubr.bf16.gmra.mxu0 %v2116_v55  ;;  %926 = vmatmul.mubr.bf16.gmra.mxu1 %v2117_v56 }
  0xd3   : > { %805 = vmatprep.mubr.bf16.mxu0 %v2118_v57  ;;  %933 = vmatprep.mubr.bf16.mxu1 %v2120_v58 }
  0xda   : > { %806 = vmatmul.mubr.bf16.gmra.mxu0 %v2122_v59  ;;  %934 = vmatmul.mubr.bf16.gmra.mxu1 %v2123_v60 }
  0xdb   : > { %813 = vmatprep.mubr.bf16.mxu0 %v2124_v61  ;;  %941 = vmatprep.mubr.bf16.mxu1 %v2126_v62 }
  0xe2   : > { %814 = vmatmul.mubr.bf16.gmra.mxu0 %v2128_v63  ;;  %942 = vmatmul.mubr.bf16.gmra.mxu1 %v2129_v0 }
  0xe3   : > { %821 = vmatprep.mubr.bf16.mxu0 %v2130_v1  ;;  %949 = vmatprep.mubr.bf16.mxu1 %v2132_v2 }
  0xea   : > { %822 = vmatmul.mubr.bf16.gmra.mxu0 %v2134_v3  ;;  %950 = vmatmul.mubr.bf16.gmra.mxu1 %v2135_v4 }
  0xeb   : > { %829 = vmatprep.mubr.bf16.mxu0 %v2136_v5  ;;  %957 = vmatprep.mubr.bf16.mxu1 %v2138_v6 }
  0xf2   : > { %830 = vmatmul.mubr.bf16.gmra.mxu0 %v2140_v7  ;;  %958 = vmatmul.mubr.bf16.gmra.mxu1 %v2141_v8 }
  0xf3   : > { %837 = vmatprep.mubr.bf16.mxu0 %v2142_v9  ;;  %965 = vmatprep.mubr.bf16.mxu1 %v2144_v10 }
  0xfa   : > { %838 = vmatmul.mubr.bf16.gmra.mxu0 %v2146_v11  ;;  %966 = vmatmul.mubr.bf16.gmra.mxu1 %v2147_v12 }
  0xfb   : > { %845 = vmatprep.mubr.bf16.mxu0 %v2148_v13  ;;  %973 = vmatprep.mubr.bf16.mxu1 %v2150_v14 }
 0x102   : > { %846 = vmatmul.mubr.bf16.gmra.mxu0 %v2152_v15  ;;  %974 = vmatmul.mubr.bf16.gmra.mxu1 %v2153_v16 }
 0x14a   : > { %v727_v17 = vpop.f32.mrf.mxu0  ;;  %v855_v18 = vpop.f32.mrf.mxu1 }
 0x14b   : > { %v982_v21 = vmul.f32 0.01, %v727_v17  ;;  %v1014_v22 = vmul.f32 0.01, %v855_v18 }
 0x14c   : > { %v729_v19 = vpop.f32.mrf.mxu0  ;;  %v857_v20 = vpop.f32.mrf.mxu1 }
 0x14d   : > { %v1046_v29 = vmax.f32 %v727_v17, %v982_v21  ;;  %v1078_v30 = vmax.f32 %v855_v18, %v1014_v22 }
 0x14e   : > { %v730_v23 = vpop.f32.mrf.mxu0  ;;  %v858_v24 = vpop.f32.mrf.mxu1 }
 0x14f   : > { %v983_v25 = vmul.f32 0.01, %v730_v23  ;;  %v1015_v26 = vmul.f32 0.01, %v858_v24 }
 0x150   : > { %v732_v27 = vpop.f32.mrf.mxu0  ;;  %v860_v28 = vpop.f32.mrf.mxu1 }
 0x151   : > { %v1047_v31 = vmax.f32 %v730_v23, %v983_v25  ;;  %v1079_v32 = vmax.f32 %v858_v24, %v1015_v26 }
 0x152   : > { %v735_v33 = vpop.f32.mrf.mxu0  ;;  %v863_v34 = vpop.f32.mrf.mxu1 }
 0x153   : > { %v1758_v35 = vpack.c.bf16 %v1047_v31, %v1046_v29  ;;  %v1838_v36 = vpack.c.bf16 %v1079_v32, %v1078_v30  ;;  %v984_v39 = vmul.f32 0.01, %v735_v33  ;;  %v1016_v40 = vmul.f32 0.01, %v863_v34 }
 0x154   : > { %v737_v37 = vpop.f32.mrf.mxu0  ;;  %v865_v38 = vpop.f32.mrf.mxu1 }
 0x155   : > { %1759 = vst [vmem:[%s2530_s17] sm:$0xff] %v1758_v35   ;;  %1930 = vst [vmem:[%s2530_s17 + $0x80] sm:$0xff] %v1838_v36   ;;  %v1048_v47 = vmax.f32 %v735_v33, %v984_v39  ;;  %v1080_v48 = vmax.f32 %v863_v34, %v1016_v40 }
 0x156   : > { %v738_v41 = vpop.f32.mrf.mxu0  ;;  %v866_v42 = vpop.f32.mrf.mxu1 }
 0x157   : > { %v985_v43 = vmul.f32 0.01, %v738_v41  ;;  %v1017_v44 = vmul.f32 0.01, %v866_v42 }
 0x158   : > { %v740_v45 = vpop.f32.mrf.mxu0  ;;  %v868_v46 = vpop.f32.mrf.mxu1 }
 0x159   : > { %v1049_v49 = vmax.f32 %v738_v41, %v985_v43  ;;  %v1081_v50 = vmax.f32 %v866_v42, %v1017_v44 }
 0x15a   : > { %v743_v51 = vpop.f32.mrf.mxu0  ;;  %v871_v52 = vpop.f32.mrf.mxu1 }
 0x15b   : > { %v1763_v53 = vpack.c.bf16 %v1049_v49, %v1048_v47  ;;  %v1843_v54 = vpack.c.bf16 %v1081_v50, %v1080_v48  ;;  %v986_v57 = vmul.f32 0.01, %v743_v51  ;;  %v1018_v58 = vmul.f32 0.01, %v871_v52 }
 0x15c   : > { %v745_v55 = vpop.f32.mrf.mxu0  ;;  %v873_v56 = vpop.f32.mrf.mxu1 }
 0x15d   : > { %1915 = vst [vmem:[%s2530_s17 + $0x8] sm:$0xff] %v1763_v53   ;;  %1931 = vst [vmem:[%s2530_s17 + $0x88] sm:$0xff] %v1843_v54   ;;  %v1050_v1 = vmax.f32 %v743_v51, %v986_v57  ;;  %v1082_v2 = vmax.f32 %v871_v52, %v1018_v58 }
 0x15e   : > { %v746_v59 = vpop.f32.mrf.mxu0  ;;  %v874_v60 = vpop.f32.mrf.mxu1 }
 0x15f   : > { %v987_v61 = vmul.f32 0.01, %v746_v59  ;;  %v1019_v62 = vmul.f32 0.01, %v874_v60 }
 0x160   : > { %v748_v63 = vpop.f32.mrf.mxu0  ;;  %v876_v0 = vpop.f32.mrf.mxu1 }
 0x161   : > { %v1051_v3 = vmax.f32 %v746_v59, %v987_v61  ;;  %v1083_v4 = vmax.f32 %v874_v60, %v1019_v62 }
 0x162   : > { %v751_v5 = vpop.f32.mrf.mxu0  ;;  %v879_v6 = vpop.f32.mrf.mxu1 }
 0x163   : > { %v1768_v7 = vpack.c.bf16 %v1051_v3, %v1050_v1  ;;  %v1848_v8 = vpack.c.bf16 %v1083_v4, %v1082_v2  ;;  %v988_v11 = vmul.f32 0.01, %v751_v5  ;;  %v1020_v12 = vmul.f32 0.01, %v879_v6 }
 0x164   : > { %v753_v9 = vpop.f32.mrf.mxu0  ;;  %v881_v10 = vpop.f32.mrf.mxu1 }
 0x165   : > { %1916 = vst [vmem:[%s2530_s17 + $0x10] sm:$0xff] %v1768_v7   ;;  %1932 = vst [vmem:[%s2530_s17 + $0x90] sm:$0xff] %v1848_v8   ;;  %v1052_v19 = vmax.f32 %v751_v5, %v988_v11  ;;  %v1084_v20 = vmax.f32 %v879_v6, %v1020_v12 }
 0x166   : > { %v754_v13 = vpop.f32.mrf.mxu0  ;;  %v882_v14 = vpop.f32.mrf.mxu1 }
 0x167   : > { %v989_v15 = vmul.f32 0.01, %v754_v13  ;;  %v1021_v16 = vmul.f32 0.01, %v882_v14 }
 0x168   : > { %v756_v17 = vpop.f32.mrf.mxu0  ;;  %v884_v18 = vpop.f32.mrf.mxu1 }
 0x169   : > { %v1053_v21 = vmax.f32 %v754_v13, %v989_v15  ;;  %v1085_v22 = vmax.f32 %v882_v14, %v1021_v16 }
 0x16a   : > { %v759_v23 = vpop.f32.mrf.mxu0  ;;  %v887_v24 = vpop.f32.mrf.mxu1 }
 0x16b   : > { %v1773_v25 = vpack.c.bf16 %v1053_v21, %v1052_v19  ;;  %v1853_v26 = vpack.c.bf16 %v1085_v22, %v1084_v20  ;;  %v990_v29 = vmul.f32 0.01, %v759_v23  ;;  %v1022_v30 = vmul.f32 0.01, %v887_v24 }
 0x16c   : > { %v761_v27 = vpop.f32.mrf.mxu0  ;;  %v889_v28 = vpop.f32.mrf.mxu1 }
 0x16d   : > { %1917 = vst [vmem:[%s2530_s17 + $0x18] sm:$0xff] %v1773_v25   ;;  %1933 = vst [vmem:[%s2530_s17 + $0x98] sm:$0xff] %v1853_v26   ;;  %v1054_v37 = vmax.f32 %v759_v23, %v990_v29  ;;  %v1086_v38 = vmax.f32 %v887_v24, %v1022_v30 }
 0x16e   : > { %v762_v31 = vpop.f32.mrf.mxu0  ;;  %v890_v32 = vpop.f32.mrf.mxu1 }
 0x16f   : > { %v991_v33 = vmul.f32 0.01, %v762_v31  ;;  %v1023_v34 = vmul.f32 0.01, %v890_v32 }
 0x170   : > { %v764_v35 = vpop.f32.mrf.mxu0  ;;  %v892_v36 = vpop.f32.mrf.mxu1 }
 0x171   : > { %v1055_v39 = vmax.f32 %v762_v31, %v991_v33  ;;  %v1087_v40 = vmax.f32 %v890_v32, %v1023_v34 }
 0x172   : > { %v767_v41 = vpop.f32.mrf.mxu0  ;;  %v895_v42 = vpop.f32.mrf.mxu1 }
 0x173   : > { %v1778_v43 = vpack.c.bf16 %v1055_v39, %v1054_v37  ;;  %v1858_v44 = vpack.c.bf16 %v1087_v40, %v1086_v38  ;;  %v992_v47 = vmul.f32 0.01, %v767_v41  ;;  %v1024_v48 = vmul.f32 0.01, %v895_v42 }
 0x174   : > { %v769_v45 = vpop.f32.mrf.mxu0  ;;  %v897_v46 = vpop.f32.mrf.mxu1 }
 0x175   : > { %1918 = vst [vmem:[%s2530_s17 + $0x20] sm:$0xff] %v1778_v43   ;;  %1934 = vst [vmem:[%s2530_s17 + $0xa0] sm:$0xff] %v1858_v44   ;;  %v1056_v55 = vmax.f32 %v767_v41, %v992_v47  ;;  %v1088_v56 = vmax.f32 %v895_v42, %v1024_v48 }
 0x176   : > { %v770_v49 = vpop.f32.mrf.mxu0  ;;  %v898_v50 = vpop.f32.mrf.mxu1 }
 0x177   : > { %v993_v51 = vmul.f32 0.01, %v770_v49  ;;  %v1025_v52 = vmul.f32 0.01, %v898_v50 }
 0x178   : > { %v772_v53 = vpop.f32.mrf.mxu0  ;;  %v900_v54 = vpop.f32.mrf.mxu1 }
 0x179   : > { %v1057_v57 = vmax.f32 %v770_v49, %v993_v51  ;;  %v1089_v58 = vmax.f32 %v898_v50, %v1025_v52 }
 0x17a   : > { %v775_v59 = vpop.f32.mrf.mxu0  ;;  %v903_v60 = vpop.f32.mrf.mxu1 }
 0x17b   : > { %v1783_v61 = vpack.c.bf16 %v1057_v57, %v1056_v55  ;;  %v1863_v62 = vpack.c.bf16 %v1089_v58, %v1088_v56  ;;  %v994_v1 = vmul.f32 0.01, %v775_v59  ;;  %v1026_v2 = vmul.f32 0.01, %v903_v60 }
 0x17c   : > { %v777_v63 = vpop.f32.mrf.mxu0  ;;  %v905_v0 = vpop.f32.mrf.mxu1 }
 0x17d   : > { %1919 = vst [vmem:[%s2530_s17 + $0x28] sm:$0xff] %v1783_v61   ;;  %1935 = vst [vmem:[%s2530_s17 + $0xa8] sm:$0xff] %v1863_v62   ;;  %v1058_v9 = vmax.f32 %v775_v59, %v994_v1  ;;  %v1090_v10 = vmax.f32 %v903_v60, %v1026_v2 }
 0x17e   : > { %v778_v3 = vpop.f32.mrf.mxu0  ;;  %v906_v4 = vpop.f32.mrf.mxu1 }
 0x17f   : > { %v995_v5 = vmul.f32 0.01, %v778_v3  ;;  %v1027_v6 = vmul.f32 0.01, %v906_v4 }
 0x180   : > { %v780_v7 = vpop.f32.mrf.mxu0  ;;  %v908_v8 = vpop.f32.mrf.mxu1 }
 0x181   : > { %v1059_v11 = vmax.f32 %v778_v3, %v995_v5  ;;  %v1091_v12 = vmax.f32 %v906_v4, %v1027_v6 }
 0x182   : > { %v783_v13 = vpop.f32.mrf.mxu0  ;;  %v911_v14 = vpop.f32.mrf.mxu1 }
 0x183   : > { %v1788_v15 = vpack.c.bf16 %v1059_v11, %v1058_v9  ;;  %v1868_v16 = vpack.c.bf16 %v1091_v12, %v1090_v10  ;;  %v996_v19 = vmul.f32 0.01, %v783_v13  ;;  %v1028_v20 = vmul.f32 0.01, %v911_v14 }
 0x184   : > { %v785_v17 = vpop.f32.mrf.mxu0  ;;  %v913_v18 = vpop.f32.mrf.mxu1 }
 0x185   : > { %1920 = vst [vmem:[%s2530_s17 + $0x30] sm:$0xff] %v1788_v15   ;;  %1936 = vst [vmem:[%s2530_s17 + $0xb0] sm:$0xff] %v1868_v16   ;;  %v1060_v27 = vmax.f32 %v783_v13, %v996_v19  ;;  %v1092_v28 = vmax.f32 %v911_v14, %v1028_v20 }
 0x186   : > { %v786_v21 = vpop.f32.mrf.mxu0  ;;  %v914_v22 = vpop.f32.mrf.mxu1 }
 0x187   : > { %v997_v23 = vmul.f32 0.01, %v786_v21  ;;  %v1029_v24 = vmul.f32 0.01, %v914_v22 }
 0x188   : > { %v788_v25 = vpop.f32.mrf.mxu0  ;;  %v916_v26 = vpop.f32.mrf.mxu1 }
 0x189   : > { %v1061_v29 = vmax.f32 %v786_v21, %v997_v23  ;;  %v1093_v30 = vmax.f32 %v914_v22, %v1029_v24 }
 0x18a   : > { %v791_v31 = vpop.f32.mrf.mxu0  ;;  %v919_v32 = vpop.f32.mrf.mxu1 }
 0x18b   : > { %v1793_v33 = vpack.c.bf16 %v1061_v29, %v1060_v27  ;;  %v1873_v34 = vpack.c.bf16 %v1093_v30, %v1092_v28  ;;  %v998_v37 = vmul.f32 0.01, %v791_v31  ;;  %v1030_v38 = vmul.f32 0.01, %v919_v32 }
 0x18c   : > { %v793_v35 = vpop.f32.mrf.mxu0  ;;  %v921_v36 = vpop.f32.mrf.mxu1 }
 0x18d   : > { %1921 = vst [vmem:[%s2530_s17 + $0x38] sm:$0xff] %v1793_v33   ;;  %1937 = vst [vmem:[%s2530_s17 + $0xb8] sm:$0xff] %v1873_v34   ;;  %v1062_v45 = vmax.f32 %v791_v31, %v998_v37  ;;  %v1094_v46 = vmax.f32 %v919_v32, %v1030_v38 }
 0x18e   : > { %v794_v39 = vpop.f32.mrf.mxu0  ;;  %v922_v40 = vpop.f32.mrf.mxu1 }
 0x18f   : > { %v999_v41 = vmul.f32 0.01, %v794_v39  ;;  %v1031_v42 = vmul.f32 0.01, %v922_v40 }
 0x190   : > { %v796_v43 = vpop.f32.mrf.mxu0  ;;  %v924_v44 = vpop.f32.mrf.mxu1 }
 0x191   : > { %v1063_v47 = vmax.f32 %v794_v39, %v999_v41  ;;  %v1095_v48 = vmax.f32 %v922_v40, %v1031_v42 }
 0x192   : > { %v799_v49 = vpop.f32.mrf.mxu0  ;;  %v927_v50 = vpop.f32.mrf.mxu1 }
 0x193   : > { %v1798_v51 = vpack.c.bf16 %v1063_v47, %v1062_v45  ;;  %v1878_v52 = vpack.c.bf16 %v1095_v48, %v1094_v46  ;;  %v1000_v55 = vmul.f32 0.01, %v799_v49  ;;  %v1032_v56 = vmul.f32 0.01, %v927_v50 }
 0x194   : > { %v801_v53 = vpop.f32.mrf.mxu0  ;;  %v929_v54 = vpop.f32.mrf.mxu1 }
 0x195   : > { %1922 = vst [vmem:[%s2530_s17 + $0x40] sm:$0xff] %v1798_v51   ;;  %1938 = vst [vmem:[%s2530_s17 + $0xc0] sm:$0xff] %v1878_v52   ;;  %v1064_v63 = vmax.f32 %v799_v49, %v1000_v55  ;;  %v1096_v0 = vmax.f32 %v927_v50, %v1032_v56 }
 0x196   : > { %v802_v57 = vpop.f32.mrf.mxu0  ;;  %v930_v58 = vpop.f32.mrf.mxu1 }
 0x197   : > { %v1001_v59 = vmul.f32 0.01, %v802_v57  ;;  %v1033_v60 = vmul.f32 0.01, %v930_v58 }
 0x198   : > { %v804_v61 = vpop.f32.mrf.mxu0  ;;  %v932_v62 = vpop.f32.mrf.mxu1 }
 0x199   : > { %v1065_v1 = vmax.f32 %v802_v57, %v1001_v59  ;;  %v1097_v2 = vmax.f32 %v930_v58, %v1033_v60 }
 0x19a   : > { %v807_v3 = vpop.f32.mrf.mxu0  ;;  %v935_v4 = vpop.f32.mrf.mxu1 }
 0x19b   : > { %v1803_v5 = vpack.c.bf16 %v1065_v1, %v1064_v63  ;;  %v1883_v6 = vpack.c.bf16 %v1097_v2, %v1096_v0  ;;  %v1002_v9 = vmul.f32 0.01, %v807_v3  ;;  %v1034_v10 = vmul.f32 0.01, %v935_v4 }
 0x19c   : > { %v809_v7 = vpop.f32.mrf.mxu0  ;;  %v937_v8 = vpop.f32.mrf.mxu1 }
 0x19d   : > { %1923 = vst [vmem:[%s2530_s17 + $0x48] sm:$0xff] %v1803_v5   ;;  %1939 = vst [vmem:[%s2530_s17 + $0xc8] sm:$0xff] %v1883_v6   ;;  %v1066_v17 = vmax.f32 %v807_v3, %v1002_v9  ;;  %v1098_v18 = vmax.f32 %v935_v4, %v1034_v10 }
 0x19e   : > { %v810_v11 = vpop.f32.mrf.mxu0  ;;  %v938_v12 = vpop.f32.mrf.mxu1 }
 0x19f   : > { %v1003_v13 = vmul.f32 0.01, %v810_v11  ;;  %v1035_v14 = vmul.f32 0.01, %v938_v12 }
 0x1a0   : > { %v812_v15 = vpop.f32.mrf.mxu0  ;;  %v940_v16 = vpop.f32.mrf.mxu1 }
 0x1a1   : > { %v1067_v19 = vmax.f32 %v810_v11, %v1003_v13  ;;  %v1099_v20 = vmax.f32 %v938_v12, %v1035_v14 }
 0x1a2   : > { %v815_v21 = vpop.f32.mrf.mxu0  ;;  %v943_v22 = vpop.f32.mrf.mxu1 }
 0x1a3   : > { %v1808_v23 = vpack.c.bf16 %v1067_v19, %v1066_v17  ;;  %v1888_v24 = vpack.c.bf16 %v1099_v20, %v1098_v18  ;;  %v1004_v27 = vmul.f32 0.01, %v815_v21  ;;  %v1036_v28 = vmul.f32 0.01, %v943_v22 }
 0x1a4   : > { %v817_v25 = vpop.f32.mrf.mxu0  ;;  %v945_v26 = vpop.f32.mrf.mxu1 }
 0x1a5   : > { %1924 = vst [vmem:[%s2530_s17 + $0x50] sm:$0xff] %v1808_v23   ;;  %1940 = vst [vmem:[%s2530_s17 + $0xd0] sm:$0xff] %v1888_v24   ;;  %v1068_v35 = vmax.f32 %v815_v21, %v1004_v27  ;;  %v1100_v36 = vmax.f32 %v943_v22, %v1036_v28 }
 0x1a6   : > { %v818_v29 = vpop.f32.mrf.mxu0  ;;  %v946_v30 = vpop.f32.mrf.mxu1 }
 0x1a7   : > { %v1005_v31 = vmul.f32 0.01, %v818_v29  ;;  %v1037_v32 = vmul.f32 0.01, %v946_v30 }
 0x1a8   : > { %v820_v33 = vpop.f32.mrf.mxu0  ;;  %v948_v34 = vpop.f32.mrf.mxu1 }
 0x1a9   : > { %v1069_v37 = vmax.f32 %v818_v29, %v1005_v31  ;;  %v1101_v38 = vmax.f32 %v946_v30, %v1037_v32 }
 0x1aa   : > { %v823_v39 = vpop.f32.mrf.mxu0  ;;  %v951_v40 = vpop.f32.mrf.mxu1 }
 0x1ab   : > { %v1813_v41 = vpack.c.bf16 %v1069_v37, %v1068_v35  ;;  %v1893_v42 = vpack.c.bf16 %v1101_v38, %v1100_v36  ;;  %v1006_v45 = vmul.f32 0.01, %v823_v39  ;;  %v1038_v46 = vmul.f32 0.01, %v951_v40 }
 0x1ac   : > { %v825_v43 = vpop.f32.mrf.mxu0  ;;  %v953_v44 = vpop.f32.mrf.mxu1 }
 0x1ad   : > { %1925 = vst [vmem:[%s2530_s17 + $0x58] sm:$0xff] %v1813_v41   ;;  %1941 = vst [vmem:[%s2530_s17 + $0xd8] sm:$0xff] %v1893_v42   ;;  %v1070_v53 = vmax.f32 %v823_v39, %v1006_v45  ;;  %v1102_v54 = vmax.f32 %v951_v40, %v1038_v46 }
 0x1ae   : > { %v826_v47 = vpop.f32.mrf.mxu0  ;;  %v954_v48 = vpop.f32.mrf.mxu1 }
 0x1af   : > { %v1007_v49 = vmul.f32 0.01, %v826_v47  ;;  %v1039_v50 = vmul.f32 0.01, %v954_v48 }
 0x1b0   : > { %v828_v51 = vpop.f32.mrf.mxu0  ;;  %v956_v52 = vpop.f32.mrf.mxu1 }
 0x1b1   : > { %v1071_v55 = vmax.f32 %v826_v47, %v1007_v49  ;;  %v1103_v56 = vmax.f32 %v954_v48, %v1039_v50 }
 0x1b2   : > { %v831_v57 = vpop.f32.mrf.mxu0  ;;  %v959_v58 = vpop.f32.mrf.mxu1 }
 0x1b3   : > { %v1818_v59 = vpack.c.bf16 %v1071_v55, %v1070_v53  ;;  %v1898_v60 = vpack.c.bf16 %v1103_v56, %v1102_v54  ;;  %v1008_v63 = vmul.f32 0.01, %v831_v57  ;;  %v1040_v0 = vmul.f32 0.01, %v959_v58 }
 0x1b4   : > { %v833_v61 = vpop.f32.mrf.mxu0  ;;  %v961_v62 = vpop.f32.mrf.mxu1 }
 0x1b5   : > { %1926 = vst [vmem:[%s2530_s17 + $0x60] sm:$0xff] %v1818_v59   ;;  %1942 = vst [vmem:[%s2530_s17 + $0xe0] sm:$0xff] %v1898_v60   ;;  %v1072_v7 = vmax.f32 %v831_v57, %v1008_v63  ;;  %v1104_v8 = vmax.f32 %v959_v58, %v1040_v0 }
 0x1b6   : > { %v834_v1 = vpop.f32.mrf.mxu0  ;;  %v962_v2 = vpop.f32.mrf.mxu1 }
 0x1b7   : > { %v1009_v3 = vmul.f32 0.01, %v834_v1  ;;  %v1041_v4 = vmul.f32 0.01, %v962_v2 }
 0x1b8   : > { %v836_v5 = vpop.f32.mrf.mxu0  ;;  %v964_v6 = vpop.f32.mrf.mxu1 }
 0x1b9   : > { %v1073_v9 = vmax.f32 %v834_v1, %v1009_v3  ;;  %v1105_v10 = vmax.f32 %v962_v2, %v1041_v4 }
 0x1ba   : > { %v839_v11 = vpop.f32.mrf.mxu0  ;;  %v967_v12 = vpop.f32.mrf.mxu1 }
 0x1bb   : > { %v1823_v13 = vpack.c.bf16 %v1073_v9, %v1072_v7  ;;  %v1903_v14 = vpack.c.bf16 %v1105_v10, %v1104_v8  ;;  %v1010_v17 = vmul.f32 0.01, %v839_v11  ;;  %v1042_v18 = vmul.f32 0.01, %v967_v12 }
 0x1bc   : > { %v841_v15 = vpop.f32.mrf.mxu0  ;;  %v969_v16 = vpop.f32.mrf.mxu1 }
 0x1bd   : > { %1927 = vst [vmem:[%s2530_s17 + $0x68] sm:$0xff] %v1823_v13   ;;  %1943 = vst [vmem:[%s2530_s17 + $0xe8] sm:$0xff] %v1903_v14   ;;  %v1074_v25 = vmax.f32 %v839_v11, %v1010_v17  ;;  %v1106_v26 = vmax.f32 %v967_v12, %v1042_v18 }
 0x1be   : > { %v842_v19 = vpop.f32.mrf.mxu0  ;;  %v970_v20 = vpop.f32.mrf.mxu1 }
 0x1bf   : > { %v1011_v21 = vmul.f32 0.01, %v842_v19  ;;  %v1043_v22 = vmul.f32 0.01, %v970_v20 }
 0x1c0   : > { %v844_v23 = vpop.f32.mrf.mxu0  ;;  %v972_v24 = vpop.f32.mrf.mxu1 }
 0x1c1   : > { %v1075_v27 = vmax.f32 %v842_v19, %v1011_v21  ;;  %v1107_v28 = vmax.f32 %v970_v20, %v1043_v22 }
 0x1c2   : > { %v847_v29 = vpop.f32.mrf.mxu0  ;;  %v975_v30 = vpop.f32.mrf.mxu1 }
 0x1c3   : > { %v1828_v31 = vpack.c.bf16 %v1075_v27, %v1074_v25  ;;  %v1908_v32 = vpack.c.bf16 %v1107_v28, %v1106_v26  ;;  %v1012_v35 = vmul.f32 0.01, %v847_v29  ;;  %v1044_v36 = vmul.f32 0.01, %v975_v30 }
 0x1c4   : > { %v849_v33 = vpop.f32.mrf.mxu0  ;;  %v977_v34 = vpop.f32.mrf.mxu1 }
 0x1c5   : > { %1928 = vst [vmem:[%s2530_s17 + $0x70] sm:$0xff] %v1828_v31   ;;  %1944 = vst [vmem:[%s2530_s17 + $0xf0] sm:$0xff] %v1908_v32   ;;  %v1076_v43 = vmax.f32 %v847_v29, %v1012_v35  ;;  %v1108_v44 = vmax.f32 %v975_v30, %v1044_v36 }
 0x1c6   : > { %v850_v37 = vpop.f32.mrf.mxu0  ;;  %v978_v38 = vpop.f32.mrf.mxu1 }
 0x1c7   : > { %v1013_v39 = vmul.f32 0.01, %v850_v37  ;;  %v1045_v40 = vmul.f32 0.01, %v978_v38 }
 0x1c8   : > { %v852_v41 = vpop.f32.mrf.mxu0  ;;  %v980_v42 = vpop.f32.mrf.mxu1 }
 0x1c9   : > { %v1077_v45 = vmax.f32 %v850_v37, %v1013_v39  ;;  %v1109_v46 = vmax.f32 %v978_v38, %v1045_v40 }
 0x1cb   : > { %v1833_v47 = vpack.c.bf16 %v1077_v45, %v1076_v43  ;;  %v1913_v48 = vpack.c.bf16 %v1109_v46, %v1108_v44 }
 0x1cd   : > { %1929 = vst [vmem:[%s2530_s17 + $0x78] sm:$0xff] %v1833_v47   ;;  %1945 = vst [vmem:[%s2530_s17 + $0xf8] sm:$0xff] %v1913_v48  }
 0x1ce   : > { %2221 = shalt.err (!%p2218_p0)
}
 0x1cf   : > { %s2222_s4 = scalar_lea.hbm %s2567_s25, 4096  ;;  %s2226_s7 = scalar_lea.hbm %s2616_s2, 8192 }
 0x1d0   : > { %p2223_p5 = scmp.ne.s32.totalorder %s2567_s25, %s2222_s4  ;;  %p2227_p4 = scmp.lt.s32.totalorder %s2567_s25, %s2616_s2 }
 0x1d1   : > { %p2228_p6 = scmp.lt.s32.totalorder %s2226_s7, %s2222_s4 }
 0x1d2   : > { %p2224_p9 = pnand %p2223_p5, %p2632_p11 }
 0x1d3   : > { %p2229_p8 = por %p2228_p6, %p2227_p4 }
 0x1d4   : > { %p2225_p1 = pneg %p2224_p9 }
 0x1d6   : > { %p2230_p3 = pnand %p2229_p8, %p2225_p1 }
 0x1d8   : > { %2233 = shalt.err (!%p2230_p3)
}
 0x1d9   : > { %s2286_s24 = smov 64   ;;  %s2287_s15 = smov 4  }
 0x1da   : > { %1984 = dma.vmem_to_hbm [thread:$0]  (%p2632_p11), %s2569_s18, 4096, %s2567_s25, %s1431_s13, %s2286_s24, %s2286_s24, %s2287_s15  }
 0x1db PF: > { %s1459_s17 = sand.u32 1, %s2264_s9   ;;  %p2633_p7 = scmp.ne.s32.totalorder %s2622_s16, 0 }
 0x1dc   : > { %p2634_p12 = scmp.ge.s32.totalorder %s2276_s12, 2  ;;  %s1460_s8 = scalar_lea.sflag [#allocation4], %s1459_s17 }
 0x1de   : > { %p1995_p10 = pnand %p2634_p12, %p2633_p7 }
 0x1e0   : > { %p1996_p2 = pneg %p1995_p10 }
 0x1e2   : > { %2259 = dma.done.wait (%p1996_p2), %s1460_s8, 4096  }
 0x1e3   : > { %2261 = vsyncadd (%p1996_p2), %s1460_s8, 4294963200  ;;  %p16_p13 = scmp.ge.s32.totalorder %s2357_s21, 4   ;;  %s2635_s9 = smov %s2268_s10 }
 0x1e4   : > { %s2636_s10 = smov %s2272_s11  ;;  %s2637_s11 = smov %s2374_s29 }
 0x1e5   : > { %s2638_s12 = smov %s2357_s21  ;;  %18 = sbr.rel (!%p16_p13) target bundleno = 6 (0x6), region = 77 }
 0x1ea   :  { %1465 = vsyncpa [#allocation3], 1 }
 0x1eb   :  { %1467 = vsyncpa [#allocation3 + $0x1], 1 }
 0x1ec   :  { %1468 = vsyncpa [#allocation6], 1 }
 0x1ed   :  { %1469 = vsyncpa [#allocation4], 1 }
 0x1ee   :  { %1471 = vsyncpa [#allocation4 + $0x1], 1 }

</bundles_post_ra>
